<compile_context>
chip_gen: v6e
topology: v6e:2x2x1
jax: 0.10.0
libtpu: 0.0.40
codegen_flags: <defaults>
</compile_context>

<pallas_src>
import math

import jax
import jax.numpy as jnp
from jax.experimental import pallas as pl
from jax.experimental.pallas import tpu as pltpu


_INV_SQRT2 = 1.0 / math.sqrt(2.0)


def _feedforward_kernel(x_ref, w_ref, b_ref, o_ref, acc_ref):
    # x_ref: [tm, tk], w_ref: [tk, tn], b_ref: [1, tn], o_ref: [tm, tn], acc_ref: [tm, tn] f32
    k = pl.program_id(2)

    @pl.when(k == 0)
    def _init():
        # Fold the bias add into accumulator init (saves a full-tile VPU add pass).
        acc_ref[...] = jnp.broadcast_to(b_ref[...].astype(jnp.float32), acc_ref.shape)

    # Native-dtype operands straight to the MXU, f32 accumulation.
    acc_ref[...] += jnp.dot(x_ref[...], w_ref[...], preferred_element_type=jnp.float32)

    @pl.when(k == pl.num_programs(2) - 1)
    def _finalize():
        y = acc_ref[...]
        # Exact GELU (torch.nn.GELU(approximate='none')): 0.5*y*(1+erf(y/sqrt(2)))
        g = 0.5 * y * (1.0 + jax.lax.erf(y * _INV_SQRT2))
        # Dropout(p=0.0) is identity.
        o_ref[...] = g.astype(o_ref.dtype)


def _round_up(x, m):
    return ((x + m - 1) // m) * m


def _tpu_generation():
    try:
        kind = jax.devices()[0].device_kind.lower()
    except Exception:
        return None
    if "v5 lite" in kind or "v5lite" in kind or "v5e" in kind:
        return "v5e"
    if "v6" in kind:
        return "v6e"
    if "v7" in kind or "tpu7" in kind:
        return "v7x"
    return "other"


_TILE_CANDIDATES = (1024, 768, 512, 384, 256, 128)


def _pick_tile(padded, cap):
    """Largest candidate <= cap that divides `padded` (padded is a multiple of 128)."""
    for c in _TILE_CANDIDATES:
        if c <= cap and c <= padded and padded % c == 0:
            return c
    return min(cap, padded)


def _config_for(gen):
    if gen == "v7x":
        # 2 TC/chip, 64 MiB physical VMEM: 1024-class tiles, keep scoped limit well under 64 MiB.
        return dict(tm_cap=1024, tn_cap=1024, tk_cap=512, n_round=256,
                    vmem_limit=48 << 20, two_core=True)
    if gen == "v6e":
        # 128 MiB physical VMEM: 1024-class tiles, bump scoped VMEM explicitly.
        return dict(tm_cap=1024, tn_cap=1024, tk_cap=512, n_round=256,
                    vmem_limit=64 << 20, two_core=False)
    if gen == "v5e":
        # 16 MiB default scoped VMEM: 512 tiles fit (~7 MiB double-buffered); 128-wide MXU.
        return dict(tm_cap=512, tn_cap=512, tk_cap=512, n_round=128,
                    vmem_limit=None, two_core=False)
    # Unknown / older generations: conservative, fits any default scoped VMEM.
    return dict(tm_cap=512, tn_cap=512, tk_cap=512, n_round=128,
                vmem_limit=None, two_core=False)


def feedforward(x, w, b, *, cast_to_bf16=False):
    """x: [batch, seq, dim], w: [dim, hidden], b: [hidden] -> [batch, seq, hidden]."""
    batch, seq, dim = x.shape
    hidden = w.shape[1]
    m = batch * seq

    cfg = _config_for(_tpu_generation())

    # Pad only to the lane/sublane minimum, never to a full large-tile multiple.
    m_pad = _round_up(m, 128)
    k_pad = _round_up(dim, 128)
    n_pad = _round_up(hidden, cfg["n_round"])

    tm = _pick_tile(m_pad, cfg["tm_cap"])
    tn = _pick_tile(n_pad, cfg["tn_cap"])
    tk = _pick_tile(k_pad, cfg["tk_cap"])

    # On 2-TensorCore chips make sure the parallel (M, N) grid has >= 2 blocks when possible,
    # preferring an N split (keeps the reduction layout intact).
    if cfg["two_core"] and (m_pad // tm) * (n_pad // tn) < 2:
        for c in _TILE_CANDIDATES:
            if c < tn and n_pad % c == 0 and n_pad // c >= 2:
                tn = c
                break
        else:
            for c in _TILE_CANDIDATES:
                if c < tm and m_pad % c == 0 and m_pad // c >= 2:
                    tm = c
                    break

    x2d = x.reshape(m, dim)
    w2d = w
    b2d = b.reshape(1, hidden)

    if cast_to_bf16:
        # Optional: bf16 operands hit the MXU's native rate and halve DMA bytes, but this
        # changes numerics vs the exact-f32 torch forward (accumulation stays f32).
        x2d = x2d.astype(jnp.bfloat16)
        w2d = w2d.astype(jnp.bfloat16)

    # Emit pad copies only where actually needed (each jnp.pad is a full HBM copy).
    if (m_pad, k_pad) != (m, dim):
        x2d = jnp.pad(x2d, ((0, m_pad - m), (0, k_pad - dim)))
    if (k_pad, n_pad) != (dim, hidden):
        w2d = jnp.pad(w2d, ((0, k_pad - dim), (0, n_pad - hidden)))
    if n_pad != hidden:
        b2d = jnp.pad(b2d, ((0, 0), (0, n_pad - hidden)))

    grid = (m_pad // tm, n_pad // tn, k_pad // tk)
    out_dtype = x.dtype

    # x is re-read once per N block, w once per M block under this tiling.
    cost = pl.CostEstimate(
        flops=2 * m_pad * k_pad * n_pad,
        transcendentals=m_pad * n_pad,  # erf in the GELU epilogue
        bytes_accessed=(
            m_pad * k_pad * grid[1] * x2d.dtype.itemsize
            + k_pad * n_pad * grid[0] * w2d.dtype.itemsize
            + n_pad * grid[0] * b2d.dtype.itemsize
            + m_pad * n_pad * jnp.dtype(out_dtype).itemsize
        ),
    )

    cp_kwargs = dict(dimension_semantics=("parallel", "parallel", "arbitrary"))
    if cfg["vmem_limit"] is not None:
        cp_kwargs["vmem_limit_bytes"] = cfg["vmem_limit"]

    out = pl.pallas_call(
        _feedforward_kernel,
        out_shape=jax.ShapeDtypeStruct((m_pad, n_pad), out_dtype),
        grid_spec=pltpu.PrefetchScalarGridSpec(
            num_scalar_prefetch=0,
            grid=grid,
            in_specs=[
                pl.BlockSpec((tm, tk), lambda i, j, k: (i, k)),  # x tile
                pl.BlockSpec((tk, tn), lambda i, j, k: (k, j)),  # w tile
                pl.BlockSpec((1, tn), lambda i, j, k: (0, j)),   # bias tile
            ],
            out_specs=pl.BlockSpec((tm, tn), lambda i, j, k: (i, j)),
            scratch_shapes=[pltpu.VMEM((tm, tn), jnp.float32)],
        ),
        compiler_params=pltpu.CompilerParams(**cp_kwargs),
        cost_estimate=cost,
    )(x2d, w2d, b2d)

    if (m_pad, n_pad) != (m, hidden):
        out = out[:m, :hidden]  # slice only emitted when padding was required
    return out.reshape(batch, seq, hidden)


def _reference(x, w, b):
    batch, seq, dim = x.shape
    hidden = w.shape[1]
    y = jnp.dot(x.reshape(-1, dim), w, preferred_element_type=jnp.float32) + b.reshape(1, hidden)
    g = 0.5 * y * (1.0 + jax.lax.erf(y * _INV_SQRT2))
    return g.astype(x.dtype).reshape(batch, seq, hidden)


if __name__ == "__main__":
    key = jax.random.PRNGKey(0)

    # Small shapes consistent with the module: batch=2, seq=8, dim=32, hidden=64.
    batch, seq, dim, hidden = 2, 8, 32, 64
    kx, kw, kb, key = jax.random.split(key, 4)
    bound = 1.0 / math.sqrt(dim)
    x = jax.random.normal(kx, (batch, seq, dim), dtype=jnp.float32)
    w = jax.random.uniform(kw, (dim, hidden), minval=-bound, maxval=bound, dtype=jnp.float32)
    b = jax.random.uniform(kb, (hidden,), minval=-bound, maxval=bound, dtype=jnp.float32)

    out = jax.block_until_ready(feedforward(x, w, b))
    ref = _reference(x, w, b)
    assert out.shape == (batch, seq, hidden)
    assert jnp.allclose(out, ref, atol=1e-5, rtol=1e-5), float(jnp.max(jnp.abs(out - ref)))

    # Larger shape to exercise a multi-block grid (M, N and K each span >1 block).
    batch2, seq2, dim2, hidden2 = 2, 512, 1024, 2048
    kx2, kw2, kb2, key = jax.random.split(key, 4)
    bound2 = 1.0 / math.sqrt(dim2)
    x2 = jax.random.normal(kx2, (batch2, seq2, dim2), dtype=jnp.float32)
    w2 = jax.random.uniform(kw2, (dim2, hidden2), minval=-bound2, maxval=bound2, dtype=jnp.float32)
    b2 = jax.random.uniform(kb2, (hidden2,), minval=-bound2, maxval=bound2, dtype=jnp.float32)

    out2 = jax.block_until_ready(feedforward(x2, w2, b2))
    ref2 = _reference(x2, w2, b2)
    assert out2.shape == (batch2, seq2, hidden2)
    assert jnp.allclose(out2, ref2, atol=1e-4, rtol=1e-4), float(jnp.max(jnp.abs(out2 - ref2)))

    # Non-tile-aligned M to confirm minimal-padding path stays correct (m = 2*300 = 600).
    batch3, seq3 = 2, 300
    kx3, key = jax.random.split(key, 2)
    x3 = jax.random.normal(kx3, (batch3, seq3, dim2), dtype=jnp.float32)
    out3 = jax.block_until_ready(feedforward(x3, w2, b2))
    ref3 = _reference(x3, w2, b2)
    assert jnp.allclose(out3, ref3, atol=1e-4, rtol=1e-4), float(jnp.max(jnp.abs(out3 - ref3)))

    print("KERNEL_OK")
</pallas_src>

<mosaic_0001>
module attributes {stable_mosaic.version = 11 : i64} {
  func.func @_feedforward_kernel(%arg0: i32, %arg1: i32, %arg2: i32, %arg3: memref<128x128xf32, #tpu.memory_space<vmem>>, %arg4: memref<128x128xf32, #tpu.memory_space<vmem>>, %arg5: memref<1x128xf32, #tpu.memory_space<vmem>>, %arg6: memref<128x128xf32, #tpu.memory_space<vmem>>, %arg7: memref<128x128xf32, #tpu.memory_space<vmem>>) attributes {dimension_semantics = [#tpu.dimension_semantics<parallel>, #tpu.dimension_semantics<parallel>, #tpu.dimension_semantics<arbitrary>], iteration_bounds = array<i64: 1, 1, 1>, scalar_prefetch = 0 : i64, scratch_operands = 1 : i64, tpu.core_type = #tpu.core_type<tc>, window_params = [{transform_indices = @transform_0, window_bounds = array<i64: 128, 128>}, {transform_indices = @transform_1, window_bounds = array<i64: 128, 128>}, {transform_indices = @transform_2, window_bounds = array<i64: 1, 128>}, {transform_indices = @transform_3, window_bounds = array<i64: 128, 128>}]} {
    %c0_i32 = arith.constant 0 : i32
    %0 = arith.cmpi eq, %arg2, %c0_i32 : i32
    %1 = arith.extui %0 : i1 to i32
    %c0_i32_0 = arith.constant 0 : i32
    %2 = arith.cmpi ne, %1, %c0_i32_0 : i32
    scf.if %2 {
      %c0_10 = arith.constant 0 : index
      %c0_11 = arith.constant 0 : index
      %12 = vector.load %arg5[%c0_10, %c0_11] : memref<1x128xf32, #tpu.memory_space<vmem>>, vector<1x128xf32>
      %13 = vector.shape_cast %12 : vector<1x128xf32> to vector<1x128xf32>
      %14 = vector.broadcast %13 : vector<1x128xf32> to vector<128x128xf32>
      %c0_12 = arith.constant 0 : index
      %c0_13 = arith.constant 0 : index
      %15 = vector.load %arg7[%c0_12, %c0_13] : memref<128x128xf32, #tpu.memory_space<vmem>>, vector<128x128xf32>
      tpu.vector_store %arg7[%c0_12, %c0_13], %14 {strides = array<i32>} : memref<128x128xf32, #tpu.memory_space<vmem>>, vector<128x128xf32>,
    } else {
    }
    %c0 = arith.constant 0 : index
    %c0_1 = arith.constant 0 : index
    %3 = vector.load %arg7[%c0, %c0_1] : memref<128x128xf32, #tpu.memory_space<vmem>>, vector<128x128xf32>
    %c0_2 = arith.constant 0 : index
    %c0_3 = arith.constant 0 : index
    %4 = vector.load %arg3[%c0_2, %c0_3] : memref<128x128xf32, #tpu.memory_space<vmem>>, vector<128x128xf32>
    %c0_4 = arith.constant 0 : index
    %c0_5 = arith.constant 0 : index
    %5 = vector.load %arg4[%c0_4, %c0_5] : memref<128x128xf32, #tpu.memory_space<vmem>>, vector<128x128xf32>
    %cst = arith.constant dense<0.000000e+00> : vector<128x128xf32>
    %6 = tpu.matmul %4, %5, %cst {dimension_numbers = #tpu.dot_dimension_numbers<[1], [0], [0], [1], [0, 0, 1, 1], [], []>} : vector<128x128xf32>, vector<128x128xf32>, vector<128x128xf32> -> vector<128x128xf32>
    %7 = arith.addf %3, %6 : vector<128x128xf32>
    %c0_6 = arith.constant 0 : index
    %c0_7 = arith.constant 0 : index
    %8 = vector.load %arg7[%c0_6, %c0_7] : memref<128x128xf32, #tpu.memory_space<vmem>>, vector<128x128xf32>
    tpu.vector_store %arg7[%c0_6, %c0_7], %7 {strides = array<i32>} : memref<128x128xf32, #tpu.memory_space<vmem>>, vector<128x128xf32>,
    %c0_i32_8 = arith.constant 0 : i32
    %9 = arith.cmpi eq, %arg2, %c0_i32_8 : i32
    %10 = arith.extui %9 : i1 to i32
    %c0_i32_9 = arith.constant 0 : i32
    %11 = arith.cmpi ne, %10, %c0_i32_9 : i32
    scf.if %11 {
      %c0_10 = arith.constant 0 : index
      %c0_11 = arith.constant 0 : index
      %12 = vector.load %arg7[%c0_10, %c0_11] : memref<128x128xf32, #tpu.memory_space<vmem>>, vector<128x128xf32>
      %cst_12 = arith.constant 5.000000e-01 : f32
      %13 = vector.broadcast %cst_12 : f32 to vector<128x128xf32>
      %14 = arith.mulf %13, %12 : vector<128x128xf32>
      %cst_13 = arith.constant 0.707106769 : f32
      %15 = vector.broadcast %cst_13 : f32 to vector<128x128xf32>
      %16 = arith.mulf %12, %15 : vector<128x128xf32>
      %17 = math.erf %16 : vector<128x128xf32>
      %cst_14 = arith.constant 1.000000e+00 : f32
      %18 = vector.broadcast %cst_14 : f32 to vector<128x128xf32>
      %19 = arith.addf %18, %17 : vector<128x128xf32>
      %20 = arith.mulf %14, %19 : vector<128x128xf32>
      %c0_15 = arith.constant 0 : index
      %c0_16 = arith.constant 0 : index
      %21 = vector.load %arg6[%c0_15, %c0_16] : memref<128x128xf32, #tpu.memory_space<vmem>>, vector<128x128xf32>
      tpu.vector_store %arg6[%c0_15, %c0_16], %20 {strides = array<i32>} : memref<128x128xf32, #tpu.memory_space<vmem>>, vector<128x128xf32>,
    } else {
    }
    return
  }
  func.func @transform_0(%arg0: i32, %arg1: i32, %arg2: i32) -> (i32, i32) {
    %c0_i32 = arith.constant 0 : i32
    return %arg0, %arg2 : i32, i32
  }
  func.func @transform_1(%arg0: i32, %arg1: i32, %arg2: i32) -> (i32, i32) {
    %c0_i32 = arith.constant 0 : i32
    return %arg2, %arg1 : i32, i32
  }
  func.func @transform_2(%arg0: i32, %arg1: i32, %arg2: i32) -> (i32, i32) {
    %c0_i32 = arith.constant 0 : i32
    %c0_i32_0 = arith.constant 0 : i32
    return %c0_i32, %arg1 : i32, i32
  }
  func.func @transform_3(%arg0: i32, %arg1: i32, %arg2: i32) -> (i32, i32) {
    %c0_i32 = arith.constant 0 : i32
    return %arg0, %arg1 : i32, i32
  }
}

</mosaic_0001>

<bundles_post_ra>
// kernel: tpu_custom_call.1
= control target key start
LH: loop header
LB: loop body
LE: loop exit
PB: predicated region body
PF: predicated region fallthrough
CT: control target
= control target key end

     0   :  { %8 = vsyncpa [#allocation4], 0  ;;  %s754_s0 = inlined_call_operand.hbm [shape: f32[128,128], index: 0, kind: input, shape index: {}]   ;;  %s755_s1 = inlined_call_operand.hbm [shape: f32[128,128], index: 1, kind: input, shape index: {}]   ;;  %s756_s2 = inlined_call_operand.vmem [shape: f32[1,128], index: 2, kind: input, shape index: {}]   ;;  %s757_s3 = inlined_call_operand.hbm [shape: f32[128,128], index: 3, kind: output, shape index: {}]  }
   0x1   :  { %9 = vsyncpa [#allocation7], 0 }
   0x2   :  { %10 = vsyncpa [#allocation5], 0  ;;  %s652_s12 = smov [#allocation3]  }
   0x3   :  { %s16_s13 = sshll.u32 %s652_s12, 4  ;;  %s17_s13 = int_to_ptr.vmem [resolvable:$true] %s16_s13 }
   0x4   :  { %s594_s14 = scalar_lea.vmem %s17_s13, 2048  ;;  %p599_p1 = scmp.lt.s32.totalorder %s17_s13, %s17_s13 }
   0x5   :  { %p595_p0 = scmp.ne.s32.totalorder %s17_s13, %s594_s14  ;;  %p600_p2 = scmp.lt.s32.totalorder %s594_s14, %s594_s14 }
   0x7   :  { %p601_p3 = por %p600_p2, %p599_p1 }
   0x9   :  { %p602_p4 = pnand %p601_p3, %p595_p0 }
   0xb   :  { %605 = shalt.err (!%p602_p4)
}
   0xc   :  { %s653_s15 = smov 128   ;;  %s654_s16 = smov 8  }
   0xd   :  { %22 = dma.hbm_to_vmem [thread:$0]  %s754_s0, 2048, %s17_s13, [#allocation4], %s653_s15, %s653_s15, %s654_s16  }
   0xe   :  { %s655_s19 = smov [#allocation6]  }
   0xf   :  { %s28_s20 = sshll.u32 %s655_s19, 4  ;;  %s29_s20 = int_to_ptr.vmem [resolvable:$true] %s28_s20 }
  0x10   :  { %s614_s21 = scalar_lea.vmem %s29_s20, 2048  ;;  %p619_p6 = scmp.lt.s32.totalorder %s29_s20, %s29_s20 }
  0x11   :  { %p615_p5 = scmp.ne.s32.totalorder %s29_s20, %s614_s21  ;;  %p620_p7 = scmp.lt.s32.totalorder %s614_s21, %s614_s21 }
  0x13   :  { %p621_p8 = por %p620_p7, %p619_p6 }
  0x15   :  { %p622_p9 = pnand %p621_p8, %p615_p5 }
  0x17   :  { %625 = shalt.err (!%p622_p9)
}
  0x18   :  { %34 = dma.hbm_to_vmem [thread:$0]  %s755_s1, 2048, %s29_s20, [#allocation7], %s653_s15, %s653_s15, %s654_s16  }
  0x19   :  { %646 = dma.done.wait [#allocation4], 2048  }
  0x1a   :  { %647 = vsyncadd [#allocation4], 4294965248 }
  0x1b   :  { %648 = dma.done.wait [#allocation7], 2048  }
  0x1c   :  { %649 = vsyncadd [#allocation7], 4294965248  ;;  %v117_v0 = vld [vmem:[#allocation6 + $0x78] sm:$0xff]  ;;  %v116_v1 = vld [vmem:[#allocation6 + $0x70] sm:$0xff] }
  0x1d   :  { %461 = vmatprep.subr.mxu0 %v117_v0  ;;  %517 = vmatprep.subr.mxu1 %v117_v0  ;;  %v115_v2 = vld [vmem:[#allocation6 + $0x68] sm:$0xff]  ;;  %v114_v3 = vld [vmem:[#allocation6 + $0x60] sm:$0xff]  ;;  %v113_v4 = vld [vmem:[#allocation6 + $0x58] sm:$0xff] }
  0x1e   :  { %462 = vmatpush3.msra.mxu0 %v117_v0  ;;  %533 = vmatpush3.msra.mxu1 %v117_v0  ;;  %v112_v5 = vld [vmem:[#allocation6 + $0x50] sm:$0xff]  ;;  %v111_v6 = vld [vmem:[#allocation6 + $0x48] sm:$0xff]  ;;  %v110_v7 = vld [vmem:[#allocation6 + $0x40] sm:$0xff] }
  0x1f   :  { %463 = vmatprep.subr.mxu0 %v116_v1  ;;  %518 = vmatprep.subr.mxu1 %v116_v1  ;;  %v109_v8 = vld [vmem:[#allocation6 + $0x38] sm:$0xff]  ;;  %v108_v9 = vld [vmem:[#allocation6 + $0x30] sm:$0xff]  ;;  %v107_v10 = vld [vmem:[#allocation6 + $0x28] sm:$0xff] }
  0x20   :  { %464 = vmatpush3.msra.mxu0 %v116_v1  ;;  %534 = vmatpush3.msra.mxu1 %v116_v1  ;;  %v106_v11 = vld [vmem:[#allocation6 + $0x20] sm:$0xff]  ;;  %v105_v12 = vld [vmem:[#allocation6 + $0x18] sm:$0xff]  ;;  %v104_v13 = vld [vmem:[#allocation6 + $0x10] sm:$0xff] }
  0x21   :  { %465 = vmatprep.subr.mxu0 %v115_v2  ;;  %519 = vmatprep.subr.mxu1 %v115_v2  ;;  %v103_v14 = vld [vmem:[#allocation6 + $0x8] sm:$0xff]  ;;  %v102_v15 = vld [vmem:[#allocation6] sm:$0xff]  ;;  %v88_v20 = vld [vmem:[#allocation3 + $0x10] sm:$0xff] }
  0x22   :  { %466 = vmatpush3.msra.mxu0 %v115_v2  ;;  %535 = vmatpush3.msra.mxu1 %v115_v2  ;;  %v86_v16 = vld [vmem:[#allocation3] sm:$0xff]  ;;  %v87_v18 = vld [vmem:[#allocation3 + $0x8] sm:$0xff]  ;;  %v96_v21 = vld [vmem:[#allocation3 + $0x50] sm:$0xff] }
  0x23   :  { %467 = vmatprep.subr.mxu0 %v114_v3  ;;  %520 = vmatprep.subr.mxu1 %v114_v3  ;;  %v94_v17 = vld [vmem:[#allocation3 + $0x40] sm:$0xff]  ;;  %v95_v19 = vld [vmem:[#allocation3 + $0x48] sm:$0xff]  ;;  %v89_v22 = vld [vmem:[#allocation3 + $0x18] sm:$0xff] }
  0x24   :  { %468 = vmatpush3.msra.mxu0 %v114_v3  ;;  %536 = vmatpush3.msra.mxu1 %v114_v3  ;;  %v97_v23 = vld [vmem:[#allocation3 + $0x58] sm:$0xff]  ;;  %v90_v24 = vld [vmem:[#allocation3 + $0x20] sm:$0xff]  ;;  %v91_v26 = vld [vmem:[#allocation3 + $0x28] sm:$0xff] }
  0x25   :  { %469 = vmatprep.subr.mxu0 %v113_v4  ;;  %521 = vmatprep.subr.mxu1 %v113_v4  ;;  %v98_v25 = vld [vmem:[#allocation3 + $0x60] sm:$0xff]  ;;  %v99_v27 = vld [vmem:[#allocation3 + $0x68] sm:$0xff]  ;;  %v92_v28 = vld [vmem:[#allocation3 + $0x30] sm:$0xff] }
  0x26   :  { %470 = vmatpush3.msra.mxu0 %v113_v4  ;;  %537 = vmatpush3.msra.mxu1 %v113_v4  ;;  %v100_v29 = vld [vmem:[#allocation3 + $0x70] sm:$0xff]  ;;  %v93_v30 = vld [vmem:[#allocation3 + $0x38] sm:$0xff]  ;;  %v428_v32 = vld [vmem:[%s756_s2] ss:$0 sm:$0xff]  ;;  %s656_s2 = smov [#allocation8]  }
  0x27   :  { %471 = vmatprep.subr.mxu0 %v112_v5  ;;  %522 = vmatprep.subr.mxu1 %v112_v5  ;;  %v101_v31 = vld [vmem:[#allocation3 + $0x78] sm:$0xff]  ;;  %s415_s24 = sshll.u32 %s656_s2, 4  ;;  %s416_s24 = int_to_ptr.vmem [resolvable:$true] %s415_s24 }
  0x28   :  { %472 = vmatpush3.msra.mxu0 %v112_v5  ;;  %538 = vmatpush3.msra.mxu1 %v112_v5  ;;  %s626_s25 = scalar_lea.vmem %s416_s24, 2048  ;;  %p631_p11 = scmp.lt.s32.totalorder %s416_s24, %s416_s24 }
  0x29   :  { %473 = vmatprep.subr.mxu0 %v111_v6  ;;  %523 = vmatprep.subr.mxu1 %v111_v6  ;;  %p627_p10 = scmp.ne.s32.totalorder %s416_s24, %s626_s25  ;;  %p632_p12 = scmp.lt.s32.totalorder %s626_s25, %s626_s25 }
  0x2a   :  { %474 = vmatpush3.msra.mxu0 %v111_v6  ;;  %539 = vmatpush3.msra.mxu1 %v111_v6 }
  0x2b   :  { %475 = vmatprep.subr.mxu0 %v110_v7  ;;  %524 = vmatprep.subr.mxu1 %v110_v7  ;;  %p633_p13 = por %p632_p12, %p631_p11 }
  0x2c   :  { %476 = vmatpush3.msra.mxu0 %v110_v7  ;;  %540 = vmatpush3.msra.mxu1 %v110_v7 }
  0x2d   :  { %477 = vmatprep.subr.mxu0 %v109_v8  ;;  %525 = vmatprep.subr.mxu1 %v109_v8  ;;  %p634_p0 = pnand %p633_p13, %p627_p10 }
  0x2e   :  { %478 = vmatpush3.msra.mxu0 %v109_v8  ;;  %541 = vmatpush3.msra.mxu1 %v109_v8 }
  0x2f   :  { %479 = vmatprep.subr.mxu0 %v108_v9  ;;  %526 = vmatprep.subr.mxu1 %v108_v9 }
  0x30   :  { %480 = vmatpush3.msra.mxu0 %v108_v9  ;;  %542 = vmatpush3.msra.mxu1 %v108_v9 }
  0x31   :  { %481 = vmatprep.subr.mxu0 %v107_v10  ;;  %527 = vmatprep.subr.mxu1 %v107_v10 }
  0x32   :  { %482 = vmatpush3.msra.mxu0 %v107_v10  ;;  %543 = vmatpush3.msra.mxu1 %v107_v10 }
  0x33   :  { %483 = vmatprep.subr.mxu0 %v106_v11  ;;  %528 = vmatprep.subr.mxu1 %v106_v11 }
  0x34   :  { %484 = vmatpush3.msra.mxu0 %v106_v11  ;;  %544 = vmatpush3.msra.mxu1 %v106_v11 }
  0x35   :  { %485 = vmatprep.subr.mxu0 %v105_v12  ;;  %529 = vmatprep.subr.mxu1 %v105_v12 }
  0x36   :  { %486 = vmatpush3.msra.mxu0 %v105_v12  ;;  %545 = vmatpush3.msra.mxu1 %v105_v12 }
  0x37   :  { %487 = vmatprep.subr.mxu0 %v104_v13  ;;  %530 = vmatprep.subr.mxu1 %v104_v13 }
  0x38   :  { %488 = vmatpush3.msra.mxu0 %v104_v13  ;;  %546 = vmatpush3.msra.mxu1 %v104_v13 }
  0x39   :  { %489 = vmatprep.subr.mxu0 %v103_v14  ;;  %531 = vmatprep.subr.mxu1 %v103_v14 }
  0x3a   :  { %490 = vmatpush3.msra.mxu0 %v103_v14  ;;  %547 = vmatpush3.msra.mxu1 %v103_v14 }
  0x3b   :  { %491 = vmatprep.subr.mxu0 %v102_v15  ;;  %532 = vmatprep.subr.mxu1 %v102_v15 }
  0x3c   :  { %492 = vmatpush3.msra.mxu0 %v102_v15  ;;  %548 = vmatpush3.msra.mxu1 %v102_v15 }
  0x3d   :  { %493 = vmatprep.mubr.f32.mxu0 %v86_v16  ;;  %505 = vmatprep.mubr.f32.mxu1 %v94_v17 }
  0x3e   :  { %494 = vmatmul.mubr.f32.vlgmr.msra.gmra.mxu0 %v87_v18  ;;  %506 = vmatmul.mubr.f32.vlgmr.msra.gmra.mxu1 %v95_v19 }
  0x3f   :  { %496 = vmatprep.mubr.f32.mxu0 %v88_v20  ;;  %508 = vmatprep.mubr.f32.mxu1 %v96_v21 }
  0x42   :  { %497 = vmatmul.mubr.f32.gmra.mxu0 %v89_v22  ;;  %509 = vmatmul.mubr.f32.gmra.mxu1 %v97_v23 }
  0x43   :  { %499 = vmatprep.mubr.f32.mxu0 %v90_v24  ;;  %511 = vmatprep.mubr.f32.mxu1 %v98_v25 }
  0x46   :  { %500 = vmatmul.mubr.f32.gmra.mxu0 %v91_v26  ;;  %512 = vmatmul.mubr.f32.gmra.mxu1 %v99_v27 }
  0x47   :  { %502 = vmatprep.mubr.f32.mxu0 %v92_v28  ;;  %514 = vmatprep.mubr.f32.mxu1 %v100_v29 }
  0x4a   :  { %503 = vmatmul.mubr.f32.gmra.mxu0 %v93_v30  ;;  %515 = vmatmul.mubr.f32.gmra.mxu1 %v101_v31 }
  0xfe   :  { %v495_v33 = vpop.f32.mrf.mxu0  ;;  %v507_v34 = vpop.f32.mrf.mxu1 }
  0xff   :  { %v264_v35 = vadd.f32 %v495_v33, %v428_v32  ;;  %v272_v36 = vadd.f32 %v507_v34, %v428_v32 }
 0x100   :  { %v184_v37 = vpop.f32.mrf.mxu0  ;;  %v224_v38 = vpop.f32.mrf.mxu1 }
 0x101   :  { %v331_v39 = vmul.f32 0.70710677, %v264_v35  ;;  %v339_v40 = vmul.f32 0.70710677, %v272_v36  ;;  %v692_v41 = vadd.f32 %v428_v32, %v184_v37  ;;  %v694_v42 = vadd.f32 %v428_v32, %v224_v38 }
 0x102   :  { %v498_v43 = vpop.f32.mrf.mxu0  ;;  %v510_v44 = vpop.f32.mrf.mxu1  ;;  %v315_v17 = vmul.f32 0.5, %v264_v35  ;;  %v323_v20 = vmul.f32 0.5, %v272_v36 }
 0x103   :  { %554 = verf.f32 %v331_v39  ;;  %v696_v45 = vadd.f32 %v498_v43, %v428_v32  ;;  %v698_v46 = vadd.f32 %v510_v44, %v428_v32  ;;  %v330_v47 = vmul.f32 0.70710677, %v692_v41 }
 0x104   :  { %556 = verf.f32 %v339_v40  ;;  %v194_v48 = vpop.f32.mrf.mxu0  ;;  %v234_v49 = vpop.f32.mrf.mxu1  ;;  %v338_v50 = vmul.f32 0.70710677, %v694_v42  ;;  %v314_v27 = vmul.f32 0.5, %v692_v41  ;;  %v322_v30 = vmul.f32 0.5, %v694_v42 }
 0x105   :  { %v333_v51 = vmul.f32 0.70710677, %v696_v45  ;;  %558 = verf.f32 %v330_v47  ;;  %v341_v52 = vmul.f32 0.70710677, %v698_v46  ;;  %v704_v53 = vadd.f32 %v428_v32, %v194_v48 }
 0x106   :  { %v706_v54 = vadd.f32 %v428_v32, %v234_v49  ;;  %v501_v55 = vpop.f32.mrf.mxu0  ;;  %v513_v56 = vpop.f32.mrf.mxu1  ;;  %560 = verf.f32 %v338_v50  ;;  %v317_v34 = vmul.f32 0.5, %v696_v45  ;;  %v325_v38 = vmul.f32 0.5, %v698_v46 }
 0x107   :  { %v708_v57 = vadd.f32 %v501_v55, %v428_v32  ;;  %v710_v58 = vadd.f32 %v513_v56, %v428_v32  ;;  %562 = verf.f32 %v333_v51  ;;  %v332_v59 = vmul.f32 0.70710677, %v704_v53 }
 0x108   :  { %v204_v60 = vpop.f32.mrf.mxu0  ;;  %v244_v61 = vpop.f32.mrf.mxu1  ;;  %564 = verf.f32 %v341_v52  ;;  %v340_v62 = vmul.f32 0.70710677, %v706_v54  ;;  %v316_v43 = vmul.f32 0.5, %v704_v53  ;;  %v324_v48 = vmul.f32 0.5, %v706_v54 }
 0x109   :  { %v335_v63 = vmul.f32 0.70710677, %v708_v57  ;;  %566 = verf.f32 %v332_v59  ;;  %v343_v0 = vmul.f32 0.70710677, %v710_v58  ;;  %v716_v1 = vadd.f32 %v428_v32, %v204_v60 }
 0x10a   :  { %v504_v2 = vpop.f32.mrf.mxu0  ;;  %v516_v3 = vpop.f32.mrf.mxu1  ;;  %568 = verf.f32 %v340_v62  ;;  %v718_v4 = vadd.f32 %v428_v32, %v244_v61  ;;  %v319_v51 = vmul.f32 0.5, %v708_v57  ;;  %v327_v56 = vmul.f32 0.5, %v710_v58 }
 0x10b   :  { %v720_v5 = vadd.f32 %v504_v2, %v428_v32  ;;  %v722_v6 = vadd.f32 %v516_v3, %v428_v32  ;;  %570 = verf.f32 %v335_v63  ;;  %v334_v7 = vmul.f32 0.70710677, %v716_v1 }
 0x10c   :  { %v214_v8 = vpop.f32.mrf.mxu0  ;;  %v254_v9 = vpop.f32.mrf.mxu1  ;;  %572 = verf.f32 %v343_v0  ;;  %v342_v10 = vmul.f32 0.70710677, %v718_v4  ;;  %v318_v61 = vmul.f32 0.5, %v716_v1  ;;  %v326_v0 = vmul.f32 0.5, %v718_v4 }
 0x10d   :  { %574 = verf.f32 %v334_v7  ;;  %v337_v11 = vmul.f32 0.70710677, %v720_v5  ;;  %v345_v12 = vmul.f32 0.70710677, %v722_v6  ;;  %v728_v13 = vadd.f32 %v428_v32, %v214_v8 }
 0x10e   :  { %576 = verf.f32 %v342_v10  ;;  %v730_v14 = vadd.f32 %v428_v32, %v254_v9  ;;  %v321_v7 = vmul.f32 0.5, %v720_v5  ;;  %v329_v9 = vmul.f32 0.5, %v722_v6 }
 0x10f   :  { %578 = verf.f32 %v337_v11  ;;  %v336_v19 = vmul.f32 0.70710677, %v728_v13  ;;  %v320_v4 = vmul.f32 0.5, %v728_v13 }
 0x110   :  { %v555_v15 = vpop.eup %554  ;;  %580 = verf.f32 %v345_v12  ;;  %v344_v22 = vmul.f32 0.70710677, %v730_v14  ;;  %v328_v5 = vmul.f32 0.5, %v730_v14 }
 0x111   :  { %v557_v16 = vpop.eup %556  ;;  %v363_v18 = vadd.f32 1.0, %v555_v15  ;;  %582 = verf.f32 %v336_v19 }
 0x112   :  { %v371_v21 = vadd.f32 1.0, %v557_v16  ;;  %v559_v23 = vpop.eup %558  ;;  %584 = verf.f32 %v344_v22 }
 0x113   :  { %v379_v24 = vmul.f32 %v363_v18, %v315_v17  ;;  %v561_v25 = vpop.eup %560  ;;  %v362_v28 = vadd.f32 1.0, %v559_v23 }
 0x114   :  { %v387_v26 = vmul.f32 %v371_v21, %v323_v20  ;;  %v563_v29 = vpop.eup %562  ;;  %v370_v31 = vadd.f32 1.0, %v561_v25 }
 0x115   :  { %395 = vst [vmem:[#allocation8 + $0x8] sm:$0xff] %v379_v24  ;;  %v565_v32 = vpop.eup %564  ;;  %v378_v33 = vmul.f32 %v362_v28, %v314_v27  ;;  %v365_v35 = vadd.f32 1.0, %v563_v29 }
 0x116   :  { %403 = vst [vmem:[#allocation8 + $0x48] sm:$0xff] %v387_v26  ;;  %v567_v36 = vpop.eup %566  ;;  %v386_v37 = vmul.f32 %v370_v31, %v322_v30  ;;  %v373_v39 = vadd.f32 1.0, %v565_v32 }
 0x117   :  { %v569_v40 = vpop.eup %568  ;;  %394 = vst [vmem:[#allocation8] sm:$0xff] %v378_v33  ;;  %v381_v41 = vmul.f32 %v365_v35, %v317_v34  ;;  %v364_v44 = vadd.f32 1.0, %v567_v36 }
 0x118   :  { %v571_v47 = vpop.eup %570  ;;  %402 = vst [vmem:[#allocation8 + $0x40] sm:$0xff] %v386_v37  ;;  %v389_v42 = vmul.f32 %v373_v39, %v325_v38  ;;  %v372_v49 = vadd.f32 1.0, %v569_v40 }
 0x119   :  { %v573_v50 = vpop.eup %572  ;;  %397 = vst [vmem:[#allocation8 + $0x18] sm:$0xff] %v381_v41  ;;  %v380_v45 = vmul.f32 %v364_v44, %v316_v43  ;;  %v367_v52 = vadd.f32 1.0, %v571_v47 }
 0x11a   :  { %v575_v46 = vpop.eup %574  ;;  %405 = vst [vmem:[#allocation8 + $0x58] sm:$0xff] %v389_v42  ;;  %v388_v55 = vmul.f32 %v372_v49, %v324_v48  ;;  %v375_v59 = vadd.f32 1.0, %v573_v50 }
 0x11b   :  { %v577_v53 = vpop.eup %576  ;;  %396 = vst [vmem:[#allocation8 + $0x10] sm:$0xff] %v380_v45  ;;  %v383_v60 = vmul.f32 %v367_v52, %v319_v51  ;;  %v366_v62 = vadd.f32 1.0, %v575_v46 }
 0x11c   :  { %v579_v54 = vpop.eup %578  ;;  %404 = vst [vmem:[#allocation8 + $0x50] sm:$0xff] %v388_v55  ;;  %v391_v63 = vmul.f32 %v375_v59, %v327_v56  ;;  %v374_v2 = vadd.f32 1.0, %v577_v53 }
 0x11d   :  { %v581_v57 = vpop.eup %580  ;;  %399 = vst [vmem:[#allocation8 + $0x28] sm:$0xff] %v383_v60  ;;  %v382_v3 = vmul.f32 %v366_v62, %v318_v61  ;;  %v369_v8 = vadd.f32 1.0, %v579_v54 }
 0x11e   :  { %407 = vst [vmem:[#allocation8 + $0x68] sm:$0xff] %v391_v63  ;;  %v390_v58 = vmul.f32 %v374_v2, %v326_v0  ;;  %v377_v10 = vadd.f32 1.0, %v581_v57  ;;  %v583_v11 = vpop.eup %582 }
 0x11f   :  { %398 = vst [vmem:[#allocation8 + $0x20] sm:$0xff] %v382_v3  ;;  %v385_v1 = vmul.f32 %v369_v8, %v321_v7  ;;  %v585_v12 = vpop.eup %584  ;;  %v368_v16 = vadd.f32 1.0, %v583_v11 }
 0x120   :  { %406 = vst [vmem:[#allocation8 + $0x60] sm:$0xff] %v390_v58  ;;  %v393_v15 = vmul.f32 %v377_v10, %v329_v9  ;;  %v376_v17 = vadd.f32 1.0, %v585_v12 }
 0x121   :  { %401 = vst [vmem:[#allocation8 + $0x38] sm:$0xff] %v385_v1  ;;  %v384_v18 = vmul.f32 %v368_v16, %v320_v4 }
 0x122   :  { %409 = vst [vmem:[#allocation8 + $0x78] sm:$0xff] %v393_v15  ;;  %v392_v19 = vmul.f32 %v376_v17, %v328_v5 }
 0x123   :  { %400 = vst [vmem:[#allocation8 + $0x30] sm:$0xff] %v384_v18 }
 0x124   :  { %408 = vst [vmem:[#allocation8 + $0x70] sm:$0xff] %v392_v19 }
 0x125   :  { %637 = shalt.err (!%p634_p0)
}
 0x126   :  { %421 = dma.vmem_to_hbm [thread:$0]  %s416_s24, 2048, %s757_s3, [#allocation5], %s653_s15, %s653_s15, %s654_s16  }
 0x127   :  { %650 = dma.done.wait [#allocation5], 2048  }
 0x128   :  { %651 = vsyncadd [#allocation5], 4294965248 }
 0x129   :  { %425 = vsyncpa [#allocation4], 1 }
 0x12a   :  { %426 = vsyncpa [#allocation7], 1 }
 0x12b   :  { %427 = vsyncpa [#allocation5], 1 }

</bundles_post_ra>
